<compile_context>
chip_gen: v6e
topology: v6e:2x2x1
jax: 0.10.0
libtpu: 0.0.40
codegen_flags: <defaults>
</compile_context>

<pallas_src>
import functools

import jax
import jax.numpy as jnp
from jax import lax
from jax.experimental import pallas as pl
from jax.experimental.pallas import tpu as pltpu

EPS = 1e-5  # PyTorch BatchNorm1d default


def _round_up(v, m):
    return (v + m - 1) // m * m


def _pick_tile(total, target, unit=128):
    """Largest multiple of `unit` that divides `total` and is <= max(target, unit)."""
    best = unit
    t = unit
    limit = min(total, max(target, unit))
    while t <= limit:
        if total % t == 0:
            best = t
        t += unit
    return best


def _single_buffered_spec(block_shape, index_map):
    """Grid-invariant operand: request single buffering (saves VMEM); fall back cleanly."""
    try:
        return pl.BlockSpec(block_shape, index_map, pipeline_mode=pl.Buffered(1))
    except (TypeError, AttributeError):
        return pl.BlockSpec(block_shape, index_map)


def _activation_fn(y, activation):
    if activation == "relu":
        return jnp.maximum(y, 0.0)
    if activation == "tanh":
        return jnp.tanh(y)
    if activation == "sigmoid":
        return jax.nn.sigmoid(y)
    return y


def _linear_stats_kernel(x_ref, w_ref, y_ref, sum_ref, sumsq_ref, acc_ref, *, n_k):
    # x: (tm, tk)  w: (tk, tn)  y: (tm, tn)  sum/sumsq: (1, 1, tn)  acc: (tm, tn) f32
    def emit(y):
        y_ref[...] = y.astype(y_ref.dtype)
        # No bias and zero-padded rows => padded rows are exactly zero, so the
        # per-channel statistics need no row masking.
        sum_ref[0] = jnp.sum(y, axis=0, keepdims=True)
        sumsq_ref[0] = jnp.sum(y * y, axis=0, keepdims=True)

    if n_k == 1:
        y = lax.dot_general(
            x_ref[...], w_ref[...],
            dimension_numbers=(((1,), (0,)), ((), ())),   # plain x @ W_T
            preferred_element_type=jnp.float32,
        )
        emit(y)
    else:
        k = pl.program_id(2)

        @pl.when(k == 0)
        def _():
            acc_ref[...] = jnp.zeros_like(acc_ref)

        acc_ref[...] += lax.dot_general(
            x_ref[...], w_ref[...],
            dimension_numbers=(((1,), (0,)), ((), ())),
            preferred_element_type=jnp.float32,
        )

        @pl.when(k == pl.num_programs(2) - 1)
        def _():
            emit(acc_ref[...])


def _linear_act_kernel(x_ref, w_ref, b_ref, o_ref, acc_ref, *, n_k, activation):
    def emit(y):
        y = y + b_ref[...]
        o_ref[...] = _activation_fn(y, activation).astype(o_ref.dtype)

    if n_k == 1:
        y = lax.dot_general(
            x_ref[...], w_ref[...],
            dimension_numbers=(((1,), (0,)), ((), ())),
            preferred_element_type=jnp.float32,
        )
        emit(y)
    else:
        k = pl.program_id(2)

        @pl.when(k == 0)
        def _():
            acc_ref[...] = jnp.zeros_like(acc_ref)

        acc_ref[...] += lax.dot_general(
            x_ref[...], w_ref[...],
            dimension_numbers=(((1,), (0,)), ((), ())),
            preferred_element_type=jnp.float32,
        )

        @pl.when(k == pl.num_programs(2) - 1)
        def _():
            emit(acc_ref[...])


def _bn_apply_kernel(y_ref, scale_ref, shift_ref, o_ref, *, activation):
    y = y_ref[...].astype(jnp.float32) * scale_ref[...] + shift_ref[...]
    o_ref[...] = _activation_fn(y, activation).astype(o_ref.dtype)


def linear_norm_forward(x, weight, bias, gamma, beta, *,
                        batch_normalization=True, activation=None, mxu_dtype=None):
    """x: (B, T, in_features) -> (B, T, out_features).  Training-mode batch stats."""
    B, T, K = x.shape
    N = weight.shape[0]
    M = B * T
    out_dtype = x.dtype

    # ---- VMEM-aware tiling ---------------------------------------------------
    try:
        vmem_cap = int(pltpu.get_tpu_info().vmem_capacity_bytes)
    except Exception:
        vmem_cap = 64 * 2**20                      # conservative (v7x per-TC)
    budget = min(vmem_cap // 2, 64 * 2**20)        # working-set budget for tile choice
    vmem_limit = min(vmem_cap * 3 // 4, 112 * 2**20)

    N_pad = _round_up(N, 128)
    K_pad = _round_up(K, 128)

    in_dtype = mxu_dtype if mxu_dtype is not None else x.dtype
    in_item = jnp.dtype(in_dtype).itemsize
    y_item = jnp.dtype(out_dtype).itemsize         # intermediate y stored in out_dtype
    out_item = jnp.dtype(out_dtype).itemsize

    # Channel / contraction tiles: multiples of 128 dividing the padded dims, so the
    # full (N_pad, K_pad) weight never has to be VMEM-resident.
    tn = _pick_tile(N_pad, 512)
    tk = _pick_tile(K_pad, 512)
    n_n = N_pad // tn
    n_k = K_pad // tk
    w_const = (n_n == 1 and n_k == 1)              # weight block grid-invariant?
    w_bufs = 1 if w_const else 2

    # Pass-1 row tile: largest multiple of 8 fitting the budget (double-buffered x & y,
    # weight buffers, f32 accumulator).
    fixed = w_bufs * tk * tn * in_item + 4 * 2 * tn * 4
    per_row = 2 * tk * in_item + 2 * tn * y_item + tn * 4
    tm_budget = max(8, ((max(budget - fixed, per_row * 8) // per_row) // 8) * 8)
    tm = min(1024, tm_budget, _round_up(M, 8))
    if M > 8:  # keep >= 2 row tiles so both v7x TensorCores get work
        tm = min(tm, _round_up(pl.cdiv(M, 2), 8))
    tm = max(8, (tm // 8) * 8)

    # Pass-2 row tile (HBM-bound streaming normalize): bigger, multiple of tm.
    per_row2 = 2 * N_pad * (y_item + out_item)
    tm2_budget = max(8, ((budget // per_row2) // 8) * 8)
    q = max(1, min(tm2_budget, 1024) // tm)
    q = min(q, max(1, pl.cdiv(M, 2 * tm)))         # >= 2 pass-2 tiles when possible
    tm2 = tm * q

    M_pad = _round_up(M, tm2)                      # multiple of both tm and tm2
    n_m = M_pad // tm

    x2d = jnp.pad(x.reshape(M, K), ((0, M_pad - M), (0, K_pad - K))).astype(in_dtype)
    # Transpose the weight ONCE in the wrapper -> canonical (K_pad, N_pad) MXU layout.
    w_t = jnp.pad(weight.T, ((0, K_pad - K), (0, N_pad - N))).astype(in_dtype)

    grid = (n_m, n_n, n_k)
    dims = ("parallel", "parallel", "arbitrary")
    x_spec = pl.BlockSpec((tm, tk), lambda i, j, k: (i, k))
    if w_const:
        w_spec = _single_buffered_spec((tk, tn), lambda i, j, k: (k, j))
    else:
        w_spec = pl.BlockSpec((tk, tn), lambda i, j, k: (k, j))
    scratch = [pltpu.VMEM((tm, tn), jnp.float32)]

    if batch_normalization:
        # ---- Pass 1: linear (no bias: it cancels under BN) + per-tile stats ----
        kernel1 = functools.partial(_linear_stats_kernel, n_k=n_k)
        cost1 = pl.CostEstimate(
            flops=2 * M_pad * N_pad * K_pad,
            transcendentals=0,
            bytes_accessed=(M_pad * K_pad + N_pad * K_pad) * in_item
            + M_pad * N_pad * y_item + 2 * n_m * N_pad * 4,
        )
        y2d, sums_t, sumsq_t = pl.pallas_call(
            kernel1,
            out_shape=[
                jax.ShapeDtypeStruct((M_pad, N_pad), out_dtype),
                jax.ShapeDtypeStruct((n_m, 1, N_pad), jnp.float32),
                jax.ShapeDtypeStruct((n_m, 1, N_pad), jnp.float32),
            ],
            grid=grid,
            in_specs=[x_spec, w_spec],
            out_specs=[
                pl.BlockSpec((tm, tn), lambda i, j, k: (i, j)),
                pl.BlockSpec((1, 1, tn), lambda i, j, k: (i, 0, j)),
                pl.BlockSpec((1, 1, tn), lambda i, j, k: (i, 0, j)),
            ],
            scratch_shapes=scratch,
            compiler_params=pltpu.CompilerParams(
                dimension_semantics=dims, vmem_limit_bytes=vmem_limit),
            cost_estimate=cost1,
        )(x2d, w_t)

        # ---- Tiny finalize in plain JAX (f32): mean/var -> scale/shift ---------
        sums = jnp.sum(sums_t[:, 0, :], axis=0)
        sumsqs = jnp.sum(sumsq_t[:, 0, :], axis=0)
        mean = sums / M
        var = jnp.maximum(sumsqs / M - mean * mean, 0.0)   # biased var (training mode)
        inv = lax.rsqrt(var + EPS)
        g = jnp.pad(gamma.astype(jnp.float32), (0, N_pad - N))
        be = jnp.pad(beta.astype(jnp.float32), (0, N_pad - N))
        scale = (g * inv).reshape(1, N_pad)
        # Linear bias was never added (it cancels in y - mean), so it is absent here too.
        shift = (be - mean * g * inv).reshape(1, N_pad)

        # ---- Pass 2: streaming normalize + affine + activation -----------------
        n2 = M_pad // tm2
        kernel2 = functools.partial(_bn_apply_kernel, activation=activation)
        cost2 = pl.CostEstimate(
            flops=3 * M_pad * N_pad,
            transcendentals=M_pad * N_pad if activation in ("tanh", "sigmoid") else 0,
            bytes_accessed=M_pad * N_pad * (y_item + out_item) + 2 * N_pad * 4,
        )
        out2d = pl.pallas_call(
            kernel2,
            out_shape=jax.ShapeDtypeStruct((M_pad, N_pad), out_dtype),
            grid=(n2,),
            in_specs=[
                pl.BlockSpec((tm2, N_pad), lambda i: (i, 0)),
                _single_buffered_spec((1, N_pad), lambda i: (0, 0)),
                _single_buffered_spec((1, N_pad), lambda i: (0, 0)),
            ],
            out_specs=pl.BlockSpec((tm2, N_pad), lambda i: (i, 0)),
            compiler_params=pltpu.CompilerParams(
                dimension_semantics=("parallel",), vmem_limit_bytes=vmem_limit),
            cost_estimate=cost2,
        )(y2d, scale, shift)
    else:
        # ---- Single fused pass: linear + bias (+ activation) -------------------
        b_p = jnp.pad(bias.astype(jnp.float32), (0, N_pad - N)).reshape(1, N_pad)
        if n_n == 1:
            b_spec = _single_buffered_spec((1, tn), lambda i, j, k: (0, j))
        else:
            b_spec = pl.BlockSpec((1, tn), lambda i, j, k: (0, j))
        kernel1 = functools.partial(_linear_act_kernel, n_k=n_k, activation=activation)
        cost1 = pl.CostEstimate(
            flops=2 * M_pad * N_pad * K_pad,
            transcendentals=M_pad * N_pad if activation in ("tanh", "sigmoid") else 0,
            bytes_accessed=(M_pad * K_pad + N_pad * K_pad) * in_item
            + M_pad * N_pad * out_item,
        )
        out2d = pl.pallas_call(
            kernel1,
            out_shape=jax.ShapeDtypeStruct((M_pad, N_pad), out_dtype),
            grid=grid,
            in_specs=[x_spec, w_spec, b_spec],
            out_specs=pl.BlockSpec((tm, tn), lambda i, j, k: (i, j)),
            scratch_shapes=scratch,
            compiler_params=pltpu.CompilerParams(
                dimension_semantics=dims, vmem_limit_bytes=vmem_limit),
            cost_estimate=cost1,
        )(x2d, w_t, b_p)

    return out2d[:M, :N].reshape(B, T, N)


def reference_forward(x, weight, bias, gamma, beta,
                      *, batch_normalization=True, activation=None):
    """Pure-JAX reference mirroring the PyTorch module (training mode, B > 1)."""
    y = jnp.einsum("btk,nk->btn", x.astype(jnp.float32), weight.astype(jnp.float32)) + bias
    if batch_normalization:
        mean = jnp.mean(y, axis=(0, 1), keepdims=True)
        var = jnp.mean((y - mean) ** 2, axis=(0, 1), keepdims=True)
        y = gamma * (y - mean) / jnp.sqrt(var + EPS) + beta
    if activation == "relu":
        y = jnp.maximum(y, 0.0)
    elif activation == "tanh":
        y = jnp.tanh(y)
    elif activation == "sigmoid":
        y = jax.nn.sigmoid(y)
    return y.astype(x.dtype)


if __name__ == "__main__":
    # TODO(synk): PyTorch's B==1 branch uses F.instance_norm (no affine, no running
    # stats); only the standard batch>1 BatchNorm1d path is implemented here.
    B, T, IN_F, OUT_F = 2, 8, 32, 32

    key = jax.random.PRNGKey(0)
    kx, kw, kb = jax.random.split(key, 3)

    x = jax.random.normal(kx, (B, T, IN_F), dtype=jnp.float32)

    # nn.Linear default init: U(-1/sqrt(in), 1/sqrt(in))
    bound = 1.0 / (IN_F ** 0.5)
    weight = jax.random.uniform(kw, (OUT_F, IN_F), minval=-bound, maxval=bound,
                                dtype=jnp.float32)
    bias = jax.random.uniform(kb, (OUT_F,), minval=-bound, maxval=bound,
                              dtype=jnp.float32)
    # nn.BatchNorm1d default affine params
    gamma = jnp.ones((OUT_F,), dtype=jnp.float32)
    beta = jnp.zeros((OUT_F,), dtype=jnp.float32)

    # BN + ReLU path
    out = linear_norm_forward(x, weight, bias, gamma, beta,
                              batch_normalization=True, activation="relu")
    out = jax.block_until_ready(out)
    ref = reference_forward(x, weight, bias, gamma, beta,
                            batch_normalization=True, activation="relu")
    assert out.shape == (B, T, OUT_F)
    assert jnp.allclose(out, ref, atol=1e-4, rtol=1e-4), "mismatch vs reference (BN+relu)"

    # Linear-only + tanh path
    out2 = linear_norm_forward(x, weight, bias, gamma, beta,
                               batch_normalization=False, activation="tanh")
    out2 = jax.block_until_ready(out2)
    ref2 = reference_forward(x, weight, bias, gamma, beta,
                             batch_normalization=False, activation="tanh")
    assert jnp.allclose(out2, ref2, atol=1e-4, rtol=1e-4), "mismatch vs reference (tanh)"

    print("KERNEL_OK")
</pallas_src>

<mosaic_0001>
module attributes {stable_mosaic.version = 11 : i64} {
  func.func @_linear_stats_kernel(%arg0: i32, %arg1: i32, %arg2: i32, %arg3: memref<8x128xf32, #tpu.memory_space<vmem>>, %arg4: memref<128x128xf32, #tpu.memory_space<vmem>>, %arg5: memref<8x128xf32, #tpu.memory_space<vmem>>, %arg6: memref<1x1x128xf32, #tpu.memory_space<vmem>>, %arg7: memref<1x1x128xf32, #tpu.memory_space<vmem>>, %arg8: memref<8x128xf32, #tpu.memory_space<vmem>>) attributes {dimension_semantics = [#tpu.dimension_semantics<parallel>, #tpu.dimension_semantics<parallel>, #tpu.dimension_semantics<arbitrary>], iteration_bounds = array<i64: 2, 1, 1>, scalar_prefetch = 0 : i64, scratch_operands = 1 : i64, tpu.core_type = #tpu.core_type<tc>, window_params = [{transform_indices = @transform_0, window_bounds = array<i64: 8, 128>}, {pipeline_mode = #tpu.pipeline_mode<synchronous>, transform_indices = @transform_1, window_bounds = array<i64: 128, 128>}, {transform_indices = @transform_2, window_bounds = array<i64: 8, 128>}, {transform_indices = @transform_3, window_bounds = array<i64: 1, 1, 128>}, {transform_indices = @transform_4, window_bounds = array<i64: 1, 1, 128>}]} {
    %c0 = arith.constant 0 : index
    %c0_0 = arith.constant 0 : index
    %0 = vector.load %arg3[%c0, %c0_0] : memref<8x128xf32, #tpu.memory_space<vmem>>, vector<8x128xf32>
    %c0_1 = arith.constant 0 : index
    %c0_2 = arith.constant 0 : index
    %1 = vector.load %arg4[%c0_1, %c0_2] : memref<128x128xf32, #tpu.memory_space<vmem>>, vector<128x128xf32>
    %cst = arith.constant dense<0.000000e+00> : vector<8x128xf32>
    %2 = tpu.matmul %0, %1, %cst {dimension_numbers = #tpu.dot_dimension_numbers<[1], [0], [0], [1], [0, 0, 1, 1], [], []>} : vector<8x128xf32>, vector<128x128xf32>, vector<8x128xf32> -> vector<8x128xf32>
    %c0_3 = arith.constant 0 : index
    %c0_4 = arith.constant 0 : index
    %3 = vector.load %arg5[%c0_3, %c0_4] : memref<8x128xf32, #tpu.memory_space<vmem>>, vector<8x128xf32>
    tpu.vector_store %arg5[%c0_3, %c0_4], %2 {strides = array<i32>} : memref<8x128xf32, #tpu.memory_space<vmem>>, vector<8x128xf32>,
    %cst_5 = arith.constant dense<0.000000e+00> : vector<128xf32>
    %4 = vector.multi_reduction <add>, %2, %cst_5 [0] : vector<8x128xf32> to vector<128xf32>
    %5 = vector.shape_cast %4 : vector<128xf32> to vector<1x128xf32>
    %c0_6 = arith.constant 0 : index
    %c0_7 = arith.constant 0 : index
    %c0_8 = arith.constant 0 : index
    %6 = vector.load %arg6[%c0_6, %c0_7, %c0_8] : memref<1x1x128xf32, #tpu.memory_space<vmem>>, vector<1x1x128xf32>
    %7 = vector.shape_cast %6 : vector<1x1x128xf32> to vector<1x128xf32>
    %8 = vector.shape_cast %5 : vector<1x128xf32> to vector<1x1x128xf32>
    tpu.vector_store %arg6[%c0_6, %c0_7, %c0_8], %8 {strides = array<i32>} : memref<1x1x128xf32, #tpu.memory_space<vmem>>, vector<1x1x128xf32>,
    %9 = arith.mulf %2, %2 : vector<8x128xf32>
    %cst_9 = arith.constant dense<0.000000e+00> : vector<128xf32>
    %10 = vector.multi_reduction <add>, %9, %cst_9 [0] : vector<8x128xf32> to vector<128xf32>
    %11 = vector.shape_cast %10 : vector<128xf32> to vector<1x128xf32>
    %c0_10 = arith.constant 0 : index
    %c0_11 = arith.constant 0 : index
    %c0_12 = arith.constant 0 : index
    %12 = vector.load %arg7[%c0_10, %c0_11, %c0_12] : memref<1x1x128xf32, #tpu.memory_space<vmem>>, vector<1x1x128xf32>
    %13 = vector.shape_cast %12 : vector<1x1x128xf32> to vector<1x128xf32>
    %14 = vector.shape_cast %11 : vector<1x128xf32> to vector<1x1x128xf32>
    tpu.vector_store %arg7[%c0_10, %c0_11, %c0_12], %14 {strides = array<i32>} : memref<1x1x128xf32, #tpu.memory_space<vmem>>, vector<1x1x128xf32>,
    return
  }
  func.func @transform_0(%arg0: i32, %arg1: i32, %arg2: i32) -> (i32, i32) {
    %c0_i32 = arith.constant 0 : i32
    return %arg0, %arg2 : i32, i32
  }
  func.func @transform_1(%arg0: i32, %arg1: i32, %arg2: i32) -> (i32, i32) {
    %c0_i32 = arith.constant 0 : i32
    return %arg2, %arg1 : i32, i32
  }
  func.func @transform_2(%arg0: i32, %arg1: i32, %arg2: i32) -> (i32, i32) {
    %c0_i32 = arith.constant 0 : i32
    return %arg0, %arg1 : i32, i32
  }
  func.func @transform_3(%arg0: i32, %arg1: i32, %arg2: i32) -> (i32, i32, i32) {
    %c0_i32 = arith.constant 0 : i32
    %c0_i32_0 = arith.constant 0 : i32
    return %arg0, %c0_i32, %arg1 : i32, i32, i32
  }
  func.func @transform_4(%arg0: i32, %arg1: i32, %arg2: i32) -> (i32, i32, i32) {
    %c0_i32 = arith.constant 0 : i32
    %c0_i32_0 = arith.constant 0 : i32
    return %arg0, %c0_i32, %arg1 : i32, i32, i32
  }
}

</mosaic_0001>

<bundles_post_ra>
// kernel: tpu_custom_call.1
= control target key start
LH: loop header
LB: loop body
LE: loop exit
PB: predicated region body
PF: predicated region fallthrough
CT: control target
= control target key end

     0   :  { %s1228_s0 = inlined_call_operand.hbm [shape: f32[16,128], index: 0, kind: input, shape index: {}]   ;;  %s1229_s1 = inlined_call_operand.hbm [shape: f32[128,128], index: 1, kind: input, shape index: {}]   ;;  %s1230_s2 = inlined_call_operand.hbm [shape: f32[16,128], index: 2, kind: output, shape index: {0}]   ;;  %s1231_s3 = inlined_call_operand.hbm [shape: f32[2,1,128], index: 3, kind: output, shape index: {1}]   ;;  %s1232_s4 = inlined_call_operand.hbm [shape: f32[2,1,128], index: 4, kind: output, shape index: {2}]  }
   0x1   :  { %1235 = sst [smem:[#allocation16_spill]] %s1229_s1 }
   0x2   :  { %10 = vsyncpa [#allocation4], 0 }
   0x3   :  { %12 = vsyncpa [#allocation4 + $0x1], 0 }
   0x4   :  { %13 = vsyncpa [#allocation7], 0 }
   0x5   :  { %14 = vsyncpa [#allocation5], 0 }
   0x6   :  { %16 = vsyncpa [#allocation5 + $0x1], 0 }
   0x7   :  { %17 = vsyncpa [#allocation10], 0 }
   0x8   :  { %19 = vsyncpa [#allocation10 + $0x1], 0  ;;  %s976_s15 = smov 0   ;;  %s978_s16 = smov 0  }
   0x9   :  { %s980_s17 = smov 0   ;;  %s982_s18 = smov 0  }
   0xa   :  { %s984_s19 = smov 0   ;;  %s986_s20 = smov 0  }
   0xb LB: > { %s1007_s21 = sadd.s32 4294967295, %s940_s20   ;;  %s1233_s22 = sadd.s32 4294967294, %s940_s20   ;;  %s940_s20 = sphi %s986_s20, %s25_s20   ;;  %s936_s19 = sphi %s984_s19, %s1254_s19   ;;  %s932_s18 = sphi %s982_s18, %s1253_s18   ;;  %s928_s17 = sphi %s980_s17, %s1252_s17   ;;  %s924_s16 = sphi %s978_s16, %s1251_s16   ;;  %s920_s15 = sphi %s976_s15, %s1250_s15  }
   0xc   : > { %p66_p0 = scmp.ne.s32.totalorder %s924_s16, %s920_s15  ;;  %p1234_p1 = scmp.eq.s32.totalorder %s1007_s21, 0 }
   0xd   : > { %p126_p3 = scmp.eq.s32.totalorder %s1233_s22, 1  ;;  %p592_p5 = scmp.ge.s32.totalorder %s940_s20, 1 }
   0xe   : > { %p1018_p4 = por %p1234_p1, %p66_p0  ;;  %p189_p7 = scmp.lt.s32.totalorder %s940_s20, 3 }
   0xf   : > { %p1023_p6 = por %p126_p3, %p66_p0  ;;  %s942_s26 = smov [#allocation6]  }
  0x10   : > { %p1028_p8 = pnand %p592_p5, %p189_p7  ;;  %s205_s27 = sshll.u32 %s942_s26, 4  ;;  %s206_s27 = int_to_ptr.vmem [resolvable:$true] %s205_s27 }
  0x11   : > { %s1237_s24 = scalar_select %p1023_p6, 1, 0 }
  0x12   : > { %p671_p9 = pneg %p1028_p8  ;;  %s44_s29 = sadd.s32 1, %s936_s19 }
  0x13   : > { %s757_s30 = scalar_lea.vmem %s206_s27, 2048  ;;  %p765_p5 = scmp.lt.s32.totalorder %s206_s27, %s206_s27 }
  0x14   : > { %p1037_p11 = pnand %p671_p9, %p1234_p1  ;;  %p758_p13 = scmp.ne.s32.totalorder %s206_s27, %s757_s30 }
  0x15   : > { %p766_p7 = scmp.lt.s32.totalorder %s757_s30, %s757_s30 }
  0x16   : > { %p748_p12 = pneg %p1037_p11 }
  0x17   : > { %p767_p2 = por %p766_p7, %p765_p5 }
  0x18   : > { %p760_p0 = pnand %p758_p13, %p748_p12 }
  0x1a   : > { %p761_p3 = pneg %p760_p0 }
  0x1c   : > { %p768_p6 = pnand %p767_p2, %p761_p3 }
  0x1e   : > { %771 = shalt.err (!%p768_p6)
}
  0x1f   : > { %s943_s5 = smov 128   ;;  %s944_s6 = smov 8  }
  0x20   : > { %s1240_s1 = sld [smem:[#allocation16_spill]]  ;;  %p46_p2 = scmp.ge.s32.totalorder %s44_s29, 2 }
  0x21   : > { %s53_s9 = sadd.s32 1, %s928_s17  ;;  %p60_p6 = scmp.ne.s32.totalorder %s928_s17, %s924_s16 }
  0x22   : > { %p61_p9 = scmp.eq.s32.totalorder %s940_s20, 0  ;;  %s1256_s29 = smov (%p46_p2, %s44_s29), 0 }
  0x23   : > { %p1242_p13 = scmp.eq.s32.totalorder %s1007_s21, 1  ;;  %s48_s12 = ssub.s32 %s936_s19, %s1256_s29 }
  0x24   : > { %p1055_p12 = por %p61_p9, %p60_p6  ;;  %p690_p3 = scmp.lt.s32.totalorder %s940_s20, 2 }
  0x25   : > { %p1061_p0 = por %p1242_p13, %p60_p6  ;;  %s219_s13 = sand.u32 1, %s928_s17  }
  0x26   : > { %674 = dma.hbm_to_vmem [thread:$0]  (!%p1037_p11), %s1240_s1, 2048, %s206_s27, [#allocation7], %s943_s5, %s943_s5, %s944_s6  }
  0x27   : > { %p51_p11 = scmp.eq.s32.totalorder %s48_s12, 0  ;;  %s595_s14 = sshll.u32 %s219_s13, 3 }
  0x28   : > { %s596_s27 = sshll.u32 %s936_s19, 7  ;;  %s223_s6 = scalar_lea.vmem [#allocation3], %s595_s14 }
  0x29   : > { %s1070_s26 = scalar_select %p51_p11, %s928_s17, %s53_s9  }
  0x2a   : > { %s229_s5 = scalar_lea.hbm %s1228_s0, %s596_s27  ;;  %s231_s7 = sshll.u32 %s223_s6, 4  ;;  %s232_s7 = int_to_ptr.vmem [resolvable:$true] %s231_s7 }
  0x2b   : > { %p1078_p5 = pnand %p690_p3, %p1055_p12  ;;  %s220_s22 = scalar_lea.sflag [#allocation4], %s219_s13 }
  0x2c   : > { %s785_s12 = scalar_lea.vmem %s232_s7, 128  ;;  %s945_s9 = smov [#allocation3]  }
  0x2d   : > { %p774_p7 = pneg %p1078_p5  ;;  %p786_p2 = scmp.ne.s32.totalorder %s232_s7, %s785_s12 }
  0x2e   : > { %s790_s1 = sshll.u32 %s945_s9, 4  ;;  %s791_s1 = int_to_ptr.vmem [resolvable:$false] %s790_s1 }
  0x2f   : > { %p788_p6 = pnand %p786_p2, %p774_p7  ;;  %s792_s27 = scalar_lea.vmem %s791_s1, 256 }
  0x30   : > { %p793_p13 = scmp.lt.s32.totalorder %s232_s7, %s791_s1  ;;  %p794_p11 = scmp.lt.s32.totalorder %s792_s27, %s785_s12 }
  0x31   : > { %p789_p9 = pneg %p788_p6 }
  0x32   : > { %p795_p10 = por %p794_p11, %p793_p13 }
  0x34   : > { %p796_p1 = pnand %p795_p10, %p789_p9 }
  0x36   : > { %799 = shalt.err (!%p796_p1)
}
  0x37   : > { %678 = dma.hbm_to_vmem [thread:$0]  (!%p1078_p5), %s229_s5, 128, %s232_s7, %s220_s22  }
  0x38   : > { %240 = sbr.rel (%p1028_p8) target bundleno = 352 (0x160), region = 28  ;;  %s1089_s10 = sand.u32 (!%p1028_p8), 1, %s924_s16  }
  0x39   : > { %s598_s13 = sshll.u32 (!%p1028_p8), %s1089_s10, 3  ;;  %s243_s14 = scalar_lea.sflag (!%p1028_p8), [#allocation4], %s1089_s10 }
  0x3a   : > { %s1095_s1 = scalar_lea.vmem (!%p1028_p8), [#allocation3], %s598_s13 }
  0x3d   : > { %903 = dma.done.wait (%p1018_p4), %s243_s14, 128  }
  0x3e   : > { %905 = vsyncadd (%p1018_p4), %s243_s14, 4294967168  ;;  %p1245_p1 = scmp.eq.s32.totalorder %s1007_s21, 0 }
  0x40   : > { %907 = dma.done.wait (%p1245_p1), [#allocation7], 2048   ;;  %p1246_p8 = pmov %p1245_p1 }
  0x41   : > { %v946_v0 = vmov 0.0   ;;  %vm947_vm0 = vmmov 0   ;;  %v300_v1 = vld [vmem:[#allocation6 + $0x78] sm:$0xff]  ;;  %v299_v2 = vld [vmem:[#allocation6 + $0x70] sm:$0xff]  ;;  %v298_v3 = vld [vmem:[#allocation6 + $0x68] sm:$0xff]  ;;  %s602_s22 = sshll.u32 %s932_s18, 7 }
  0x42   : > { %909 = vsyncadd (%p1246_p8), [#allocation7], 4294965248  ;;  %624 = vmatprep.subr.mxu0 %v946_v0  ;;  %656 = vmatprep.mubr.msk.f32.mxu0 %vm947_vm0, %v946_v0  ;;  %v297_v4 = vld [vmem:[#allocation6 + $0x60] sm:$0xff]  ;;  %v296_v5 = vld [vmem:[#allocation6 + $0x58] sm:$0xff]  ;;  %s270_s23 = scalar_lea.vmem [#allocation8], %s598_s13  ;;  %s1112_s5 = scalar_lea.hbm %s1230_s2, %s602_s22 }
  0x43   : > { %625 = vmatpush3.msra.mxu0 %v300_v1  ;;  %v295_v6 = vld [vmem:[#allocation6 + $0x50] sm:$0xff]  ;;  %v294_v7 = vld [vmem:[#allocation6 + $0x48] sm:$0xff]  ;;  %v293_v8 = vld [vmem:[#allocation6 + $0x40] sm:$0xff]  ;;  %s410_s25 = sshll.u32 %s270_s23, 4  ;;  %s388_s6 = scalar_lea.sflag [#allocation5], %s1089_s10  ;;  %s1114_s25 = int_to_ptr.vmem [resolvable:$true] %s410_s25 }
  0x44   : > { %626 = vmatprep.subr.mxu0 %v946_v0  ;;  %v292_v9 = vld [vmem:[#allocation6 + $0x38] sm:$0xff]  ;;  %v291_v10 = vld [vmem:[#allocation6 + $0x30] sm:$0xff]  ;;  %v290_v11 = vld [vmem:[#allocation6 + $0x28] sm:$0xff]  ;;  %s800_s7 = scalar_lea.vmem %s1114_s25, 128  ;;  %s948_s8 = smov [#allocation8]  }
  0x45   : > { %627 = vmatpush3.msra.mxu0 %v299_v2  ;;  %v289_v12 = vld [vmem:[#allocation6 + $0x20] sm:$0xff]  ;;  %v288_v13 = vld [vmem:[#allocation6 + $0x18] sm:$0xff]  ;;  %v287_v14 = vld [vmem:[#allocation6 + $0x10] sm:$0xff]  ;;  %p801_p4 = scmp.ne.s32.totalorder %s1114_s25, %s800_s7  ;;  %s804_s12 = sshll.u32 %s948_s8, 4  ;;  %s805_s12 = int_to_ptr.vmem [resolvable:$false] %s804_s12 }
  0x46   : > { %628 = vmatprep.subr.mxu0 %v946_v0  ;;  %v286_v15 = vld [vmem:[#allocation6 + $0x8] sm:$0xff]  ;;  %v285_v16 = vld [vmem:[#allocation6] sm:$0xff]  ;;  %v284_v17 = vld [vmem:[%s1095_s1] sm:$0xff]  ;;  %s806_s9 = scalar_lea.vmem %s805_s12, 256  ;;  %p807_p3 = scmp.lt.s32.totalorder %s1114_s25, %s805_s12 }
  0x47   : > { %629 = vmatpush3.msra.mxu0 %v298_v3  ;;  %p802_p10 = pnand %p801_p4, %p1061_p0  ;;  %p808_p5 = scmp.lt.s32.totalorder %s806_s9, %s800_s7 }
  0x48   : > { %630 = vmatprep.subr.mxu0 %v946_v0 }
  0x49   : > { %631 = vmatpush3.msra.mxu0 %v297_v4  ;;  %p803_p12 = pneg %p802_p10  ;;  %p809_p7 = por %p808_p5, %p807_p3 }
  0x4a   : > { %632 = vmatprep.subr.mxu0 %v946_v0 }
  0x4b   : > { %633 = vmatpush3.msra.mxu0 %v296_v5  ;;  %p810_p2 = pnand %p809_p7, %p803_p12 }
  0x4c   : > { %634 = vmatprep.subr.mxu0 %v946_v0 }
  0x4d   : > { %635 = vmatpush3.msra.mxu0 %v295_v6 }
  0x4e   : > { %636 = vmatprep.subr.mxu0 %v946_v0 }
  0x4f   : > { %637 = vmatpush3.msra.mxu0 %v294_v7 }
  0x50   : > { %638 = vmatprep.subr.mxu0 %v946_v0 }
  0x51   : > { %639 = vmatpush3.msra.mxu0 %v293_v8 }
  0x52   : > { %640 = vmatprep.subr.mxu0 %v946_v0 }
  0x53   : > { %641 = vmatpush3.msra.mxu0 %v292_v9 }
  0x54   : > { %642 = vmatprep.subr.mxu0 %v946_v0 }
  0x55   : > { %643 = vmatpush3.msra.mxu0 %v291_v10 }
  0x56   : > { %644 = vmatprep.subr.mxu0 %v946_v0 }
  0x57   : > { %645 = vmatpush3.msra.mxu0 %v290_v11 }
  0x58   : > { %646 = vmatprep.subr.mxu0 %v946_v0 }
  0x59   : > { %647 = vmatpush3.msra.mxu0 %v289_v12 }
  0x5a   : > { %648 = vmatprep.subr.mxu0 %v946_v0 }
  0x5b   : > { %649 = vmatpush3.msra.mxu0 %v288_v13 }
  0x5c   : > { %650 = vmatprep.subr.mxu0 %v946_v0 }
  0x5d   : > { %651 = vmatpush3.msra.mxu0 %v287_v14 }
  0x5e   : > { %652 = vmatprep.subr.mxu0 %v946_v0 }
  0x5f   : > { %653 = vmatpush3.msra.mxu0 %v286_v15 }
  0x60   : > { %654 = vmatprep.subr.mxu0 %v946_v0 }
  0x61   : > { %655 = vmatpush3.msra.mxu0 %v285_v16 }
  0x62   : > { %657 = vmatmul.mubr.f32.vlgmr.msra.gmra.mxu0 %v284_v17 }
 0x122   : > { %v367_v18 = vpop.f32.mrf.mxu0 }
 0x123   : > { %v372_v19 = vrot.slane %v367_v18, 4  ;;  %v379_v20 = vmul.f32 %v367_v18, %v367_v18  ;;  %371 = vst [vmem:[%s270_s23] sm:$0xff] %v367_v18 }
 0x124   : > { %v658_v21 = vpop.f32.mrf.mxu0 }
 0x125   : > { %813 = shalt.err (!%p810_p2)
}
 0x126   : > { %s814_s27 = scalar_lea.hbm %s1112_s5, 128  ;;  %s818_s1 = scalar_lea.hbm %s1230_s2, 256 }
 0x127   : > { %p815_p6 = scmp.ne.s32.totalorder %s1112_s5, %s814_s27  ;;  %p819_p11 = scmp.lt.s32.totalorder %s1112_s5, %s1230_s2 }
 0x128   : > { %p820_p1 = scmp.lt.s32.totalorder %s818_s1, %s814_s27 }
 0x129   : > { %p816_p9 = pnand %p815_p6, %p1061_p0 }
 0x12a   : > { %p821_p8 = por %p820_p1, %p819_p11 }
 0x12b   : > { %p817_p13 = pneg %p816_p9 }
 0x12d   : > { %p822_p4 = pnand %p821_p8, %p817_p13 }
 0x12f   : > { %825 = shalt.err (!%p822_p4)
}
 0x130   : > { %665 = dma.vmem_to_hbm [thread:$0]  (%p1061_p0), %s1114_s25, 128, %s1112_s5, %s388_s6   ;;  %v373_v22 = vadd.f32 %v372_v19, %v367_v18  ;;  %v380_v23 = vrot.slane %v379_v20, 4 }
 0x131   : > { %s392_s28 = sand.u32 1, %s1007_s21   ;;  %s603_s30 = sshll.u32 %s932_s18, 4 }
 0x132   : > { %v374_v24 = vrot.slane %v373_v22, 2  ;;  %v381_v25 = vadd.f32 %v380_v23, %v379_v20  ;;  %s276_s7 = scalar_lea.vmem [#allocation9], %s1089_s10  ;;  %s282_s12 = scalar_lea.vmem [#allocation11], %s1089_s10 }
 0x133   : > { %s424_s8 = sshll.u32 %s276_s7, 4  ;;  %s438_s9 = sshll.u32 %s282_s12, 4  ;;  %s1148_s8 = int_to_ptr.vmem [resolvable:$true] %s424_s8  ;;  %s1155_s9 = int_to_ptr.vmem [resolvable:$true] %s438_s9 }
 0x134   : > { %v375_v26 = vadd.f32 %v374_v24, %v373_v22  ;;  %v382_v27 = vrot.slane %v381_v25, 2  ;;  %s1146_s5 = scalar_lea.hbm %s1231_s3, %s603_s30  ;;  %s1153_s6 = scalar_lea.hbm %s1232_s4, %s603_s30 }
 0x135   : > { %s1157_s13 = scalar_lea.sflag [#allocation10], %s392_s28  ;;  %s826_s14 = scalar_lea.vmem %s1148_s8, 16 }
 0x136   : > { %v376_v28 = vrot.slane %v375_v26, 1  ;;  %v383_v29 = vadd.f32 %v382_v27, %v381_v25  ;;  %p827_p10 = scmp.ne.s32.totalorder %s1148_s8, %s826_s14  ;;  %s949_s1 = smov [#allocation9]  }
 0x137   : > { %s830_s22 = sshll.u32 %s949_s1, 4  ;;  %s831_s22 = int_to_ptr.vmem [resolvable:$false] %s830_s22 }
 0x138   : > { %v377_v30 = vadd.f32 %v376_v28, %v375_v26  ;;  %v384_v31 = vrot.slane %v383_v29, 1  ;;  %p828_p12 = pnand %p827_p10, %p1061_p0  ;;  %s832_s23 = scalar_lea.vmem %s831_s22, 32 }
 0x139   : > { %p833_p5 = scmp.lt.s32.totalorder %s1148_s8, %s831_s22  ;;  %p834_p7 = scmp.lt.s32.totalorder %s832_s23, %s826_s14 }
 0x13a   : > { %v385_v32 = vadd.f32 %v384_v31, %v383_v29  ;;  %378 = vst [vmem:[%s276_s7] sm:$0x1] %v377_v30  ;;  %p829_p3 = pneg %p828_p12 }
 0x13b   : > { %p835_p2 = por %p834_p7, %p833_p5 }
 0x13d   : > { %p836_p6 = pnand %p835_p2, %p829_p3 }
 0x13f   : > { %839 = shalt.err (!%p836_p6)
}
 0x140   : > { %s840_s28 = scalar_lea.hbm %s1146_s5, 16  ;;  %s844_s27 = scalar_lea.hbm %s1231_s3, 32 }
 0x141   : > { %p841_p9 = scmp.ne.s32.totalorder %s1146_s5, %s840_s28  ;;  %p845_p1 = scmp.lt.s32.totalorder %s1146_s5, %s1231_s3 }
 0x142   : > { %p846_p8 = scmp.lt.s32.totalorder %s844_s27, %s840_s28 }
 0x143   : > { %p842_p13 = pnand %p841_p9, %p1061_p0 }
 0x144   : > { %p847_p4 = por %p846_p8, %p845_p1 }
 0x145   : > { %p843_p11 = pneg %p842_p13 }
 0x147   : > { %p848_p10 = pnand %p847_p4, %p843_p11 }
 0x149   : > { %851 = shalt.err (!%p848_p10)
}
 0x14a   : > { %666 = dma.vmem_to_hbm [thread:$0]  (%p1061_p0), %s1148_s8, 16, %s1146_s5, %s1157_s13   ;;  %386 = vst [vmem:[%s282_s12] sm:$0x1] %v385_v32 }
 0x14b   : > { %s852_s21 = scalar_lea.vmem %s1155_s9, 16  ;;  %s950_s14 = smov [#allocation11]  }
 0x14c   : > { %p853_p12 = scmp.ne.s32.totalorder %s1155_s9, %s852_s21  ;;  %s856_s1 = sshll.u32 %s950_s14, 4  ;;  %s857_s1 = int_to_ptr.vmem [resolvable:$false] %s856_s1 }
 0x14d   : > { %s858_s22 = scalar_lea.vmem %s857_s1, 32  ;;  %p859_p7 = scmp.lt.s32.totalorder %s1155_s9, %s857_s1 }
 0x14e   : > { %p854_p3 = pnand %p853_p12, %p1061_p0  ;;  %p860_p2 = scmp.lt.s32.totalorder %s858_s22, %s852_s21 }
 0x150   : > { %p855_p5 = pneg %p854_p3  ;;  %p861_p6 = por %p860_p2, %p859_p7 }
 0x152   : > { %p862_p9 = pnand %p861_p6, %p855_p5 }
 0x154   : > { %865 = shalt.err (!%p862_p9)
}
 0x155   : > { %s866_s10 = scalar_lea.hbm %s1153_s6, 16  ;;  %s870_s5 = scalar_lea.hbm %s1232_s4, 32 }
 0x156   : > { %p867_p13 = scmp.ne.s32.totalorder %s1153_s6, %s866_s10  ;;  %p871_p8 = scmp.lt.s32.totalorder %s1153_s6, %s1232_s4 }
 0x157   : > { %p872_p4 = scmp.lt.s32.totalorder %s870_s5, %s866_s10 }
 0x158   : > { %p868_p11 = pnand %p867_p13, %p1061_p0 }
 0x159   : > { %p873_p10 = por %p872_p4, %p871_p8 }
 0x15a   : > { %p869_p1 = pneg %p868_p11 }
 0x15c   : > { %p874_p12 = pnand %p873_p10, %p869_p1 }
 0x15e   : > { %877 = shalt.err (!%p874_p12)
}
 0x15f   : > { %667 = dma.vmem_to_hbm [thread:$0]  (%p1061_p0), %s1155_s9, 16, %s1153_s6, %s1157_s13  }
 0x160 PF: > { %s450_s30 = sand.u32 1, %s920_s15   ;;  %p1247_p3 = scmp.ne.s32.totalorder %s1237_s24, 0 }
 0x161   : > { %p1248_p5 = scmp.ge.s32.totalorder %s940_s20, 2  ;;  %s451_s7 = scalar_lea.sflag [#allocation5], %s450_s30 }
 0x163   : > { %p680_p7 = pnand %p1248_p5, %p1247_p3 }
 0x165   : > { %p681_p2 = pneg %p680_p7 }
 0x167   : > { %911 = dma.done.wait (%p681_p2), %s451_s7, 128  }
 0x168   : > { %913 = vsyncadd (%p681_p2), %s451_s7, 4294967168  ;;  %s1249_s27 = sadd.s32 4294967294, %s940_s20  }
 0x169   : > { %s459_s25 = sand.u32 1, %s1249_s27  }
 0x16a   : > { %s460_s11 = scalar_lea.sflag [#allocation10], %s459_s25 }
 0x16b   : > { %915 = dma.done.wait (%p681_p2), %s460_s11, 32  }
 0x16c   : > { %917 = vsyncadd (%p681_p2), %s460_s11, 4294967264  ;;  %s25_s20 = sadd.s32 1, %s940_s20   ;;  %s1250_s15 = smov %s924_s16 }
 0x16d   : > { %p22_p0 = scmp.ge.s32.totalorder %s25_s20, 4   ;;  %s1251_s16 = smov %s928_s17 }
 0x16e   : > { %s1252_s17 = smov %s1070_s26  ;;  %s1253_s18 = smov %s936_s19 }
 0x16f   : > { %s1254_s19 = smov %s1256_s29  ;;  %24 = sbr.rel (!%p22_p0) target bundleno = 11 (0xb), region = 110 }
 0x174   :  { %472 = vsyncpa [#allocation4], 1 }
 0x175   :  { %474 = vsyncpa [#allocation4 + $0x1], 1 }
 0x176   :  { %475 = vsyncpa [#allocation7], 1 }
 0x177   :  { %476 = vsyncpa [#allocation5], 1 }
 0x178   :  { %478 = vsyncpa [#allocation5 + $0x1], 1 }
 0x179   :  { %479 = vsyncpa [#allocation10], 1 }
 0x17a   :  { %481 = vsyncpa [#allocation10 + $0x1], 1 }

</bundles_post_ra>
